<compile_context>
chip_gen: v6e
topology: v6e:2x2x1
jax: 0.10.0
libtpu: 0.0.40
codegen_flags: <defaults>
</compile_context>

<pallas_src>
import functools

import jax
import jax.numpy as jnp
from jax.experimental import pallas as pl
from jax.experimental.pallas import tpu as pltpu


def _round_up(x, m):
    return (x + m - 1) // m * m


def _dice_kernel(x_ref, t_ref, w_ref, out_ref,
                 inter_acc, xs_acc, ts_acc, *, inv_n):
    # x_ref, t_ref : (NC, T)  input-dtype tiles in VMEM (one HW chunk)
    # w_ref        : (NC, 1)  f32 per-(sample, class) weights (w[n*C+c] = w_c)
    # out_ref      : (1, 1)   f32 scalar loss in SMEM
    # *_acc        : (NC, T)  f32 running partial sums (VMEM scratch)
    pid = pl.program_id(0)

    @pl.when(pid == 0)
    def _init():
        inter_acc[...] = jnp.zeros_like(inter_acc)
        xs_acc[...] = jnp.zeros_like(xs_acc)
        ts_acc[...] = jnp.zeros_like(ts_acc)

    # Cast per tile (VPU work hidden under the DMA); accumulate in f32.
    x = x_ref[...].astype(jnp.float32)
    t = t_ref[...].astype(jnp.float32)

    inter_acc[...] += x * t
    xs_acc[...] += x
    ts_acc[...] += t

    @pl.when(pid == pl.num_programs(0) - 1)
    def _finalize():
        smooth = jnp.float32(1.0)
        inter = jnp.sum(inter_acc[...], axis=-1, keepdims=True)  # (NC, 1)
        xs = jnp.sum(xs_acc[...], axis=-1, keepdims=True)        # (NC, 1)
        ts = jnp.sum(ts_acc[...], axis=-1, keepdims=True)        # (NC, 1)
        per = 2.0 * (inter + smooth) / (xs + ts + smooth)        # (NC, 1)
        # sum_c w_c * (1 - (1/N) * sum_n per[n,c]) == (1/N) * sum_{n,c} w * (1 - per)
        total = jnp.sum(w_ref[...] * (1.0 - per)) * jnp.float32(inv_n)
        out_ref[0, 0] = total


def _pick_tile(nc, hw):
    """Lane-tile width T (multiple of 128) and padded HW (multiple of T)."""
    budget = 1 << 20                       # ~1 MiB per f32 input block
    max_t = (budget // (4 * nc)) // 128 * 128
    max_t = max(128, min(16384, max_t))
    hwp = _round_up(hw, 128)
    if hwp <= max_t:
        return hwp, hwp
    return max_t, _round_up(hw, max_t)


def multiclass_dice_loss(inputs, targets, weights=None):
    """inputs, targets: (N, C, H, W) arrays (any float dtype). Returns f32 scalar."""
    N, C, H, W = inputs.shape
    HW = H * W
    NC = N * C

    # Keep original dtype (no wrapper upcast) -> kernel casts per tile.
    x = inputs.reshape(NC, HW)
    t = targets.reshape(NC, HW)

    T, HWp = _pick_tile(NC, HW)
    if HWp != HW:
        # zero padding leaves all three running sums unchanged
        x = jnp.pad(x, ((0, 0), (0, HWp - HW)))
        t = jnp.pad(t, ((0, 0), (0, HWp - HW)))

    if weights is None:
        w_c = jnp.ones((C,), jnp.float32)
    else:
        w_c = jnp.asarray(weights, jnp.float32).reshape(C)
    w_nc = jnp.broadcast_to(w_c[None, :], (N, C)).reshape(NC, 1)

    grid = (HWp // T,)
    # TODO(synk): optionally add a "parallel" grid axis (per-core partial sums
    # combined in the wrapper) to use both TensorCores on v7x.
    out = pl.pallas_call(
        functools.partial(_dice_kernel, inv_n=1.0 / N),
        out_shape=jax.ShapeDtypeStruct((1, 1), jnp.float32),
        grid_spec=pltpu.PrefetchScalarGridSpec(
            num_scalar_prefetch=0,
            grid=grid,
            in_specs=[
                pl.BlockSpec((NC, T), lambda i: (0, i)),
                pl.BlockSpec((NC, T), lambda i: (0, i)),
                pl.BlockSpec((NC, 1), lambda i: (0, 0)),
            ],
            out_specs=pl.BlockSpec((1, 1), lambda i: (0, 0),
                                   memory_space=pltpu.SMEM),
            scratch_shapes=[pltpu.VMEM((NC, T), jnp.float32)] * 3,
        ),
        compiler_params=pltpu.CompilerParams(
            dimension_semantics=("arbitrary",),
        ),
    )(x, t, w_nc)
    return out[0, 0]


def _reference_loss(inputs, targets, weights=None):
    """Pure-JAX transcription of the PyTorch module, for verification."""
    N, C = targets.shape[0], targets.shape[1]
    total = 0.0
    for i in range(C):
        inp_flat = inputs[:, i].reshape(N, -1)
        tgt_flat = targets[:, i].reshape(N, -1)
        inter = (inp_flat * tgt_flat).sum(1)
        loss = 2.0 * (inter + 1.0) / (inp_flat.sum(1) + tgt_flat.sum(1) + 1.0)
        loss = 1.0 - loss.sum() / N
        if weights is not None:
            loss = loss * weights[i]
        total = total + loss
    return total


if __name__ == "__main__":
    key = jax.random.PRNGKey(0)
    k1, k2 = jax.random.split(key)

    N, C, H, W = 2, 4, 16, 16
    # predictions: sigmoid-like probabilities
    x = jax.nn.sigmoid(jax.random.normal(k1, (N, C, H, W), dtype=jnp.float32))
    # one-hot encoded target over C classes, NCHW
    cls = jax.random.randint(k2, (N, H, W), 0, C)
    t = jax.nn.one_hot(cls, C, dtype=jnp.float32).transpose(0, 3, 1, 2)

    # f32, unweighted
    loss = multiclass_dice_loss(x, t)
    jax.block_until_ready(loss)
    ref = _reference_loss(x, t)
    assert jnp.allclose(loss, ref, rtol=1e-5, atol=1e-5), (loss, ref)

    # f32, weighted
    w = jnp.array([0.1, 0.2, 0.3, 0.4], jnp.float32)
    loss_w = multiclass_dice_loss(x, t, w)
    jax.block_until_ready(loss_w)
    ref_w = _reference_loss(x, t, w)
    assert jnp.allclose(loss_w, ref_w, rtol=1e-5, atol=1e-5), (loss_w, ref_w)

    # bf16 inputs: no wrapper upcast; cast happens per-tile inside the kernel
    xb = x.astype(jnp.bfloat16)
    tb = t.astype(jnp.bfloat16)
    loss_b = multiclass_dice_loss(xb, tb)
    jax.block_until_ready(loss_b)
    ref_b = _reference_loss(xb.astype(jnp.float32), tb.astype(jnp.float32))
    assert jnp.allclose(loss_b, ref_b, rtol=1e-3, atol=1e-3), (loss_b, ref_b)

    print("KERNEL_OK")
</pallas_src>

<mosaic_0001>
module attributes {stable_mosaic.version = 11 : i64} {
  func.func @_dice_kernel(%arg0: i32, %arg1: memref<8x256xf32, #tpu.memory_space<vmem>>, %arg2: memref<8x256xf32, #tpu.memory_space<vmem>>, %arg3: memref<8x1xf32, #tpu.memory_space<vmem>>, %arg4: memref<1x1xf32, #tpu.memory_space<smem>>, %arg5: memref<8x256xf32, #tpu.memory_space<vmem>>, %arg6: memref<8x256xf32, #tpu.memory_space<vmem>>, %arg7: memref<8x256xf32, #tpu.memory_space<vmem>>) attributes {dimension_semantics = [#tpu.dimension_semantics<arbitrary>], iteration_bounds = array<i64: 1>, scalar_prefetch = 0 : i64, scratch_operands = 3 : i64, tpu.core_type = #tpu.core_type<tc>, window_params = [{transform_indices = @transform_0, window_bounds = array<i64: 8, 256>}, {transform_indices = @transform_1, window_bounds = array<i64: 8, 256>}, {pipeline_mode = #tpu.pipeline_mode<synchronous>, transform_indices = @transform_2, window_bounds = array<i64: 8, 1>}, {transform_indices = @transform_3, window_bounds = array<i64: 1, 1>}]} {
    %c0_i32 = arith.constant 0 : i32
    %0 = arith.cmpi eq, %arg0, %c0_i32 : i32
    %1 = arith.extui %0 : i1 to i32
    %c0_i32_0 = arith.constant 0 : i32
    %2 = arith.cmpi ne, %1, %c0_i32_0 : i32
    scf.if %2 {
      %cst = arith.constant 0.000000e+00 : f32
      %18 = vector.broadcast %cst : f32 to vector<8x256xf32>
      %c0_18 = arith.constant 0 : index
      %c0_19 = arith.constant 0 : index
      %19 = vector.load %arg5[%c0_18, %c0_19] : memref<8x256xf32, #tpu.memory_space<vmem>>, vector<8x256xf32>
      tpu.vector_store %arg5[%c0_18, %c0_19], %18 {strides = array<i32>} : memref<8x256xf32, #tpu.memory_space<vmem>>, vector<8x256xf32>,
      %cst_20 = arith.constant 0.000000e+00 : f32
      %20 = vector.broadcast %cst_20 : f32 to vector<8x256xf32>
      %c0_21 = arith.constant 0 : index
      %c0_22 = arith.constant 0 : index
      %21 = vector.load %arg6[%c0_21, %c0_22] : memref<8x256xf32, #tpu.memory_space<vmem>>, vector<8x256xf32>
      tpu.vector_store %arg6[%c0_21, %c0_22], %20 {strides = array<i32>} : memref<8x256xf32, #tpu.memory_space<vmem>>, vector<8x256xf32>,
      %cst_23 = arith.constant 0.000000e+00 : f32
      %22 = vector.broadcast %cst_23 : f32 to vector<8x256xf32>
      %c0_24 = arith.constant 0 : index
      %c0_25 = arith.constant 0 : index
      %23 = vector.load %arg7[%c0_24, %c0_25] : memref<8x256xf32, #tpu.memory_space<vmem>>, vector<8x256xf32>
      tpu.vector_store %arg7[%c0_24, %c0_25], %22 {strides = array<i32>} : memref<8x256xf32, #tpu.memory_space<vmem>>, vector<8x256xf32>,
    } else {
    }
    %c0 = arith.constant 0 : index
    %c0_1 = arith.constant 0 : index
    %3 = vector.load %arg1[%c0, %c0_1] : memref<8x256xf32, #tpu.memory_space<vmem>>, vector<8x256xf32>
    %c0_2 = arith.constant 0 : index
    %c0_3 = arith.constant 0 : index
    %4 = vector.load %arg2[%c0_2, %c0_3] : memref<8x256xf32, #tpu.memory_space<vmem>>, vector<8x256xf32>
    %c0_4 = arith.constant 0 : index
    %c0_5 = arith.constant 0 : index
    %5 = vector.load %arg5[%c0_4, %c0_5] : memref<8x256xf32, #tpu.memory_space<vmem>>, vector<8x256xf32>
    %6 = arith.mulf %3, %4 : vector<8x256xf32>
    %7 = arith.addf %5, %6 : vector<8x256xf32>
    %c0_6 = arith.constant 0 : index
    %c0_7 = arith.constant 0 : index
    %8 = vector.load %arg5[%c0_6, %c0_7] : memref<8x256xf32, #tpu.memory_space<vmem>>, vector<8x256xf32>
    tpu.vector_store %arg5[%c0_6, %c0_7], %7 {strides = array<i32>} : memref<8x256xf32, #tpu.memory_space<vmem>>, vector<8x256xf32>,
    %c0_8 = arith.constant 0 : index
    %c0_9 = arith.constant 0 : index
    %9 = vector.load %arg6[%c0_8, %c0_9] : memref<8x256xf32, #tpu.memory_space<vmem>>, vector<8x256xf32>
    %10 = arith.addf %9, %3 : vector<8x256xf32>
    %c0_10 = arith.constant 0 : index
    %c0_11 = arith.constant 0 : index
    %11 = vector.load %arg6[%c0_10, %c0_11] : memref<8x256xf32, #tpu.memory_space<vmem>>, vector<8x256xf32>
    tpu.vector_store %arg6[%c0_10, %c0_11], %10 {strides = array<i32>} : memref<8x256xf32, #tpu.memory_space<vmem>>, vector<8x256xf32>,
    %c0_12 = arith.constant 0 : index
    %c0_13 = arith.constant 0 : index
    %12 = vector.load %arg7[%c0_12, %c0_13] : memref<8x256xf32, #tpu.memory_space<vmem>>, vector<8x256xf32>
    %13 = arith.addf %12, %4 : vector<8x256xf32>
    %c0_14 = arith.constant 0 : index
    %c0_15 = arith.constant 0 : index
    %14 = vector.load %arg7[%c0_14, %c0_15] : memref<8x256xf32, #tpu.memory_space<vmem>>, vector<8x256xf32>
    tpu.vector_store %arg7[%c0_14, %c0_15], %13 {strides = array<i32>} : memref<8x256xf32, #tpu.memory_space<vmem>>, vector<8x256xf32>,
    %c0_i32_16 = arith.constant 0 : i32
    %15 = arith.cmpi eq, %arg0, %c0_i32_16 : i32
    %16 = arith.extui %15 : i1 to i32
    %c0_i32_17 = arith.constant 0 : i32
    %17 = arith.cmpi ne, %16, %c0_i32_17 : i32
    scf.if %17 {
      %c0_18 = arith.constant 0 : index
      %c0_19 = arith.constant 0 : index
      %18 = vector.load %arg5[%c0_18, %c0_19] : memref<8x256xf32, #tpu.memory_space<vmem>>, vector<8x256xf32>
      %cst = arith.constant dense<0.000000e+00> : vector<8xf32>
      %19 = vector.multi_reduction <add>, %18, %cst [1] : vector<8x256xf32> to vector<8xf32>
      %20 = vector.shape_cast %19 : vector<8xf32> to vector<8x1xf32>
      %c0_20 = arith.constant 0 : index
      %c0_21 = arith.constant 0 : index
      %21 = vector.load %arg6[%c0_20, %c0_21] : memref<8x256xf32, #tpu.memory_space<vmem>>, vector<8x256xf32>
      %cst_22 = arith.constant dense<0.000000e+00> : vector<8xf32>
      %22 = vector.multi_reduction <add>, %21, %cst_22 [1] : vector<8x256xf32> to vector<8xf32>
      %23 = vector.shape_cast %22 : vector<8xf32> to vector<8x1xf32>
      %c0_23 = arith.constant 0 : index
      %c0_24 = arith.constant 0 : index
      %24 = vector.load %arg7[%c0_23, %c0_24] : memref<8x256xf32, #tpu.memory_space<vmem>>, vector<8x256xf32>
      %cst_25 = arith.constant dense<0.000000e+00> : vector<8xf32>
      %25 = vector.multi_reduction <add>, %24, %cst_25 [1] : vector<8x256xf32> to vector<8xf32>
      %26 = vector.shape_cast %25 : vector<8xf32> to vector<8x1xf32>
      %cst_26 = arith.constant 1.000000e+00 : f32
      %27 = vector.broadcast %cst_26 : f32 to vector<8x1xf32>
      %28 = arith.addf %20, %27 : vector<8x1xf32>
      %cst_27 = arith.constant 2.000000e+00 : f32
      %29 = vector.broadcast %cst_27 : f32 to vector<8x1xf32>
      %30 = arith.mulf %29, %28 : vector<8x1xf32>
      %31 = arith.addf %23, %26 : vector<8x1xf32>
      %cst_28 = arith.constant 1.000000e+00 : f32
      %32 = vector.broadcast %cst_28 : f32 to vector<8x1xf32>
      %33 = arith.addf %31, %32 : vector<8x1xf32>
      %34 = arith.divf %30, %33 : vector<8x1xf32>
      %c0_29 = arith.constant 0 : index
      %c0_30 = arith.constant 0 : index
      %35 = vector.load %arg3[%c0_29, %c0_30] : memref<8x1xf32, #tpu.memory_space<vmem>>, vector<8x1xf32>
      %cst_31 = arith.constant 1.000000e+00 : f32
      %36 = vector.broadcast %cst_31 : f32 to vector<8x1xf32>
      %37 = arith.subf %36, %34 : vector<8x1xf32>
      %38 = arith.mulf %35, %37 : vector<8x1xf32>
      %39 = vector.shape_cast %38 : vector<8x1xf32> to vector<1x8x1xf32>
      %cst_32 = arith.constant dense<0.000000e+00> : vector<1xf32>
      %40 = vector.multi_reduction <add>, %39, %cst_32 [1, 2] : vector<1x8x1xf32> to vector<1xf32>
      %41 = vector.shape_cast %40 : vector<1xf32> to vector<1x1x1xf32>
      %42 = vector.extract %41[0, 0, 0] : f32 from vector<1x1x1xf32>
      %cst_33 = arith.constant 5.000000e-01 : f32
      %43 = arith.mulf %42, %cst_33 : f32
      %c0_34 = arith.constant 0 : index
      %c0_35 = arith.constant 0 : index
      %44 = memref.load %arg4[%c0_34, %c0_35] : memref<1x1xf32, #tpu.memory_space<smem>>
      memref.store %43, %arg4[%c0_34, %c0_35] : memref<1x1xf32, #tpu.memory_space<smem>>
    } else {
    }
    return
  }
  func.func @transform_0(%arg0: i32) -> (i32, i32) {
    %c0_i32 = arith.constant 0 : i32
    %c0_i32_0 = arith.constant 0 : i32
    return %c0_i32, %arg0 : i32, i32
  }
  func.func @transform_1(%arg0: i32) -> (i32, i32) {
    %c0_i32 = arith.constant 0 : i32
    %c0_i32_0 = arith.constant 0 : i32
    return %c0_i32, %arg0 : i32, i32
  }
  func.func @transform_2(%arg0: i32) -> (i32, i32) {
    %c0_i32 = arith.constant 0 : i32
    %c0_i32_0 = arith.constant 0 : i32
    %c0_i32_1 = arith.constant 0 : i32
    return %c0_i32, %c0_i32_0 : i32, i32
  }
  func.func @transform_3(%arg0: i32) -> (i32, i32) {
    %c0_i32 = arith.constant 0 : i32
    %c0_i32_0 = arith.constant 0 : i32
    %c0_i32_1 = arith.constant 0 : i32
    return %c0_i32, %c0_i32_0 : i32, i32
  }
}

</mosaic_0001>

<bundles_post_ra>
// kernel: tpu_custom_call.1
= control target key start
LH: loop header
LB: loop body
LE: loop exit
PB: predicated region body
PF: predicated region fallthrough
CT: control target
= control target key end

     0   :  { %8 = vsyncpa [#allocation6], 0  ;;  %s225_s0 = inlined_call_operand.hbm [shape: f32[8,256], index: 0, kind: input, shape index: {}]   ;;  %s226_s1 = inlined_call_operand.hbm [shape: f32[8,256], index: 1, kind: input, shape index: {}]   ;;  %s227_s2 = inlined_call_operand.vmem [shape: f32[8,1], index: 2, kind: input, shape index: {}]   ;;  %s228_s3 = inlined_call_operand.hbm [shape: f32[1,1], index: 3, kind: output, shape index: {}]  }
   0x1   :  { %9 = vsyncpa [#allocation9], 0 }
   0x2   :  { %10 = vsyncpa [#allocation7], 0  ;;  %s190_s12 = smov [#allocation5]   ;;  %s191_s14 = smov [#allocation8]  }
   0x3   :  { %s17_s13 = sshll.u32 %s190_s12, 4  ;;  %s27_s15 = sshll.u32 %s191_s14, 4  ;;  %s18_s13 = int_to_ptr.vmem [resolvable:$true] %s17_s13  ;;  %s28_s15 = int_to_ptr.vmem [resolvable:$true] %s27_s15 }
   0x4   :  { %s144_s16 = scalar_lea.vmem %s18_s13, 256  ;;  %p149_p1 = scmp.lt.s32.totalorder %s18_s13, %s18_s13 }
   0x5   :  { %p145_p0 = scmp.ne.s32.totalorder %s18_s13, %s144_s16  ;;  %p150_p2 = scmp.lt.s32.totalorder %s144_s16, %s144_s16 }
   0x7   :  { %p151_p3 = por %p150_p2, %p149_p1 }
   0x9   :  { %p152_p4 = pnand %p151_p3, %p145_p0 }
   0xb   :  { %155 = shalt.err (!%p152_p4)
}
   0xc   :  { %20 = dma.hbm_to_vmem [thread:$0]  %s225_s0, 256, %s18_s13, [#allocation6]  }
   0xd   :  { %s164_s19 = scalar_lea.vmem %s28_s15, 256  ;;  %p169_p6 = scmp.lt.s32.totalorder %s28_s15, %s28_s15 }
   0xe   :  { %p165_p5 = scmp.ne.s32.totalorder %s28_s15, %s164_s19  ;;  %p170_p7 = scmp.lt.s32.totalorder %s164_s19, %s164_s19 }
  0x10   :  { %p171_p8 = por %p170_p7, %p169_p6 }
  0x12   :  { %p172_p9 = pnand %p171_p8, %p165_p5 }
  0x14   :  { %175 = shalt.err (!%p172_p9)
}
  0x15   :  { %30 = dma.hbm_to_vmem [thread:$0]  %s226_s1, 256, %s28_s15, [#allocation9]  }
  0x16   :  { %184 = dma.done.wait [#allocation6], 256  }
  0x17   :  { %185 = vsyncadd [#allocation6], 4294967040 }
  0x18   :  { %186 = dma.done.wait [#allocation9], 256  }
  0x19   :  { %187 = vsyncadd [#allocation9], 4294967040  ;;  %v49_v0 = vld [vmem:[#allocation5] sm:$0xff]  ;;  %v50_v1 = vld [vmem:[#allocation5 + $0x8] sm:$0xff]  ;;  %vm100_vm0 = vcmask 7168   ;;  %s192_s24 = smov [#allocation10]  }
  0x1a   :  { %v51_v2 = vld [vmem:[#allocation8] sm:$0xff]  ;;  %v83_v3 = vadd.f32 %v50_v1, %v49_v0  ;;  %v52_v4 = vld [vmem:[#allocation8 + $0x8] sm:$0xff]  ;;  %v97_v18 = vld [vmem:[%s227_s2] sm:$0xff] }
  0x1b   :  { %v55_v5 = vmul.f32 %v51_v2, %v49_v0  ;;  %v56_v6 = vmul.f32 %v52_v4, %v50_v1  ;;  %v88_v7 = vadd.f32 %v52_v4, %v51_v2 }
  0x1c   :  { %84 = vadd.xlane.f32.xlu0 %v83_v3 }
  0x1d   :  { %v78_v8 = vadd.f32 %v56_v6, %v55_v5 }
  0x1f   :  { %79 = vadd.xlane.f32.xlu1 %v78_v8 }
  0x20   :  { %89 = vadd.xlane.f32.xlu0 %v88_v7 }
  0xa5   :  { %v85_v9 = vpop.xlane.xlu0 %84 }
  0xa8   :  { %v80_v13 = vpop.xlane.xlu1 %79 }
  0xa9   :  { %v90_v10 = vpop.xlane.xlu0 %89  ;;  %v91_v14 = vadd.f32 1.0, %v80_v13 }
  0xaa   :  { %v93_v11 = vadd.f32 %v90_v10, %v85_v9 }
  0xab   :  { %v92_v15 = vmul.f32 2.0, %v91_v14 }
  0xac   :  { %v94_v12 = vadd.f32 1.0, %v93_v11 }
  0xae   :  { %134 = vrcp.f32 %v94_v12 }
  0xbb   :  { %v135_v16 = vpop.eup %134 }
  0xbc   :  { %v96_v17 = vmul.f32 %v135_v16, %v92_v15 }
  0xbe   :  { %v98_v19 = vsub.f32 1.0, %v96_v17 }
  0xc0   :  { %v99_v20 = vmul.f32 %v98_v19, %v97_v18 }
  0xc2   :  { %v101_v21 = vsel %vm100_vm0, %v99_v20, 0.0 }
  0xc3   :  { %102 = vadd.xlane.f32.xlu1 %v101_v21 }
 0x14c   :  { %v103_v22 = vpop.xlane.xlu1 %102 }
 0x14d   :  { %v104_v23 = vrot.slane %v103_v22, 4 }
 0x14f   :  { %v105_v24 = vadd.f32 %v104_v23, %v103_v22 }
 0x151   :  { %v106_v25 = vrot.slane %v105_v24, 2 }
 0x153   :  { %v107_v26 = vadd.f32 %v106_v25, %v105_v24 }
 0x155   :  { %v108_v27 = vrot.slane %v107_v26, 1 }
 0x157   :  { %v109_v28 = vadd.f32 %v108_v27, %v107_v26 }
 0x159   :  { %129 = vpush %v109_v28 }
 0x18a   :  { %s130_s22 = spop %129 }
 0x18b   :  { %s111_s23 = smul.f32 0.5, %s130_s22 }
 0x18d   :  { %113 = sst [smem:[#allocation10]] %s111_s23 }
 0x18e   :  { %121 = dma.smem_to_hbm %s192_s24, 16, %s228_s3, [#allocation7]  }
 0x18f   :  { %188 = dma.done.wait [#allocation7], 16  }
 0x190   :  { %189 = vsyncadd [#allocation7], 4294967280 }
 0x191   :  { %125 = sfence }
 0x192   :  { %126 = vsyncpa [#allocation6], 1 }
 0x193   :  { %127 = vsyncpa [#allocation9], 1 }
 0x194   :  { %128 = vsyncpa [#allocation7], 1 }

</bundles_post_ra>
